<compile_context>
chip_gen: v6e
topology: v6e:2x2x1
jax: 0.10.0
libtpu: 0.0.40
codegen_flags: <defaults>
</compile_context>

<pallas_src>
import functools

import jax
import jax.numpy as jnp
from jax.experimental import pallas as pl
from jax.experimental.pallas import tpu as pltpu

_LANE = 128
_TARGET_BLOCK_BYTES = 2 * 1024 * 1024  # ~2 MiB block -> ~4 MiB double-buffered


def _round_up(v, m):
    return ((v + m - 1) // m) * m


def _l_color_kernel(x_ref, o_ref, acc_ref, *, inv_n):
    # x_ref:   (B_TILE, 3, CHUNK)   input chunk (native dtype)
    # o_ref:   (B_TILE, 1, 1, 1)    per-image loss (f32), resident across chunks
    # acc_ref: (B_TILE, 3)          f32 running per-channel sums
    k = pl.program_id(1)

    @pl.when(k == 0)
    def _init():
        acc_ref[...] = jnp.zeros_like(acc_ref)

    # One fused reduction over the lane axis for every image/channel in the
    # block; accumulate partial per-channel sums in f32.
    x = x_ref[...].astype(jnp.float32)           # (B_TILE, 3, CHUNK)
    acc_ref[...] += jnp.sum(x, axis=-1)          # (B_TILE, 3)

    @pl.when(k == pl.num_programs(1) - 1)
    def _finalize():
        means = acc_ref[...] * inv_n             # true mean (zero pad is inert)
        mr = means[:, 0:1]
        mg = means[:, 1:2]
        mb = means[:, 2:3]
        drg = (mr - mg) ** 2
        drb = (mr - mb) ** 2
        dgb = (mb - mg) ** 2
        kval = jnp.sqrt(drg * drg + drb * drb + dgb * dgb)   # (B_TILE, 1)
        o_ref[...] = kval.reshape(o_ref.shape).astype(o_ref.dtype)


def l_color(x):
    """x: (b, 3, h, w) float array -> k: (b, 1, 1, 1) float32."""
    b, c, h, w = x.shape
    assert c == 3, "L_color expects 3 channels (r, g, b)"

    itemsize = jnp.dtype(x.dtype).itemsize
    n = h * w
    n_lane = _round_up(n, _LANE)                  # lane-dense spatial length
    row_bytes = 3 * n_lane * itemsize             # one image, full spatial extent

    # Batch tiling: pack small images together so each block is ~2 MiB.
    if row_bytes >= _TARGET_BLOCK_BYTES:
        b_tile = 1
    else:
        b_tile = int(min(b, max(1, _TARGET_BLOCK_BYTES // row_bytes)))

    # Spatial chunking: fixed-size, lane-aligned chunks, balanced so the last
    # chunk is not mostly padding. (When b_tile > 1 this collapses to 1 chunk.)
    chunk_cap = max(
        _LANE,
        (_TARGET_BLOCK_BYTES // (b_tile * 3 * itemsize * _LANE)) * _LANE,
    )
    n_chunks = max(1, -(-n_lane // chunk_cap))             # ceil div
    chunk_len = _round_up(-(-n_lane // n_chunks), _LANE)   # balanced chunk size
    n_pad = chunk_len * n_chunks

    b_pad = _round_up(b, b_tile)
    n_btiles = b_pad // b_tile

    # Flatten spatial dims; zero-pad lanes / batch only when needed.  Zero
    # padding does not change the sums and the divisor stays the true h*w.
    x3 = x.reshape(b, 3, n)
    if n_pad != n or b_pad != b:
        x3 = jnp.pad(x3, ((0, b_pad - b), (0, 0), (0, n_pad - n)))

    kernel = functools.partial(_l_color_kernel, inv_n=1.0 / float(n))

    out = pl.pallas_call(
        kernel,
        out_shape=jax.ShapeDtypeStruct((b_pad, 1, 1, 1), jnp.float32),
        grid_spec=pltpu.PrefetchScalarGridSpec(
            num_scalar_prefetch=0,
            grid=(n_btiles, n_chunks),
            in_specs=[
                pl.BlockSpec((b_tile, 3, chunk_len), lambda i, k: (i, 0, k)),
            ],
            out_specs=pl.BlockSpec((b_tile, 1, 1, 1), lambda i, k: (i, 0, 0, 0)),
            scratch_shapes=[pltpu.VMEM((b_tile, 3), jnp.float32)],
        ),
        compiler_params=pltpu.CompilerParams(
            dimension_semantics=("parallel", "arbitrary"),
        ),
        cost_estimate=pl.CostEstimate(
            flops=int(b_pad * 3 * n_pad + 32 * b_pad),
            transcendentals=int(b_pad),
            bytes_accessed=int(b_pad * 3 * n_pad * itemsize + b_pad * 4),
        ),
    )(x3)

    return out[:b]


def _l_color_ref(x):
    mean_rgb = jnp.mean(x.astype(jnp.float32), axis=(2, 3), keepdims=True)
    mr = mean_rgb[:, 0:1]
    mg = mean_rgb[:, 1:2]
    mb = mean_rgb[:, 2:3]
    drg = (mr - mg) ** 2
    drb = (mr - mb) ** 2
    dgb = (mb - mg) ** 2
    return jnp.sqrt(drg ** 2 + drb ** 2 + dgb ** 2)


if __name__ == "__main__":
    key = jax.random.PRNGKey(0)
    k1, k2 = jax.random.split(key)

    # Small batched images (batch-tiling path, grid = (1, 1)).
    x1 = jax.random.uniform(k1, (2, 3, 16, 16), dtype=jnp.float32)
    out1 = jax.block_until_ready(l_color(x1))
    ref1 = _l_color_ref(x1)
    assert out1.shape == (2, 1, 1, 1)
    assert jnp.allclose(out1, ref1, atol=1e-5, rtol=1e-4)

    # Awkward spatial size (exercises lane padding with the true-n divisor).
    x2 = jax.random.uniform(k2, (1, 3, 24, 20), dtype=jnp.float32)
    out2 = jax.block_until_ready(l_color(x2))
    ref2 = _l_color_ref(x2)
    assert out2.shape == (1, 1, 1, 1)
    assert jnp.allclose(out2, ref2, atol=1e-5, rtol=1e-4)

    print("KERNEL_OK")
</pallas_src>

<mosaic_0001>
module attributes {stable_mosaic.version = 11 : i64} {
  func.func @_l_color_kernel(%arg0: i32, %arg1: i32, %arg2: memref<2x3x256xf32, #tpu.memory_space<vmem>>, %arg3: memref<2x1x1x1xf32, #tpu.memory_space<vmem>>, %arg4: memref<2x3xf32, #tpu.memory_space<vmem>>) attributes {dimension_semantics = [#tpu.dimension_semantics<parallel>, #tpu.dimension_semantics<arbitrary>], iteration_bounds = array<i64: 1, 1>, scalar_prefetch = 0 : i64, scratch_operands = 1 : i64, tpu.core_type = #tpu.core_type<tc>, window_params = [{transform_indices = @transform_0, window_bounds = array<i64: 2, 3, 256>}, {transform_indices = @transform_1, window_bounds = array<i64: 2, 1, 1, 1>}]} {
    %c0_i32 = arith.constant 0 : i32
    %0 = arith.cmpi eq, %arg1, %c0_i32 : i32
    %1 = arith.extui %0 : i1 to i32
    %c0_i32_0 = arith.constant 0 : i32
    %2 = arith.cmpi ne, %1, %c0_i32_0 : i32
    scf.if %2 {
      %cst_9 = arith.constant 0.000000e+00 : f32
      %11 = vector.broadcast %cst_9 : f32 to vector<2x3xf32>
      %c0_10 = arith.constant 0 : index
      %c0_11 = arith.constant 0 : index
      %12 = vector.load %arg4[%c0_10, %c0_11] : memref<2x3xf32, #tpu.memory_space<vmem>>, vector<2x3xf32>
      tpu.vector_store %arg4[%c0_10, %c0_11], %11 {strides = array<i32>} : memref<2x3xf32, #tpu.memory_space<vmem>>, vector<2x3xf32>,
    } else {
    }
    %c0 = arith.constant 0 : index
    %c0_1 = arith.constant 0 : index
    %c0_2 = arith.constant 0 : index
    %3 = vector.load %arg2[%c0, %c0_1, %c0_2] : memref<2x3x256xf32, #tpu.memory_space<vmem>>, vector<2x3x256xf32>
    %c0_3 = arith.constant 0 : index
    %c0_4 = arith.constant 0 : index
    %4 = vector.load %arg4[%c0_3, %c0_4] : memref<2x3xf32, #tpu.memory_space<vmem>>, vector<2x3xf32>
    %cst = arith.constant dense<0.000000e+00> : vector<2x3xf32>
    %5 = vector.multi_reduction <add>, %3, %cst [2] : vector<2x3x256xf32> to vector<2x3xf32>
    %6 = arith.addf %4, %5 : vector<2x3xf32>
    %c0_5 = arith.constant 0 : index
    %c0_6 = arith.constant 0 : index
    %7 = vector.load %arg4[%c0_5, %c0_6] : memref<2x3xf32, #tpu.memory_space<vmem>>, vector<2x3xf32>
    tpu.vector_store %arg4[%c0_5, %c0_6], %6 {strides = array<i32>} : memref<2x3xf32, #tpu.memory_space<vmem>>, vector<2x3xf32>,
    %c0_i32_7 = arith.constant 0 : i32
    %8 = arith.cmpi eq, %arg1, %c0_i32_7 : i32
    %9 = arith.extui %8 : i1 to i32
    %c0_i32_8 = arith.constant 0 : i32
    %10 = arith.cmpi ne, %9, %c0_i32_8 : i32
    scf.if %10 {
      %c0_9 = arith.constant 0 : index
      %c0_10 = arith.constant 0 : index
      %11 = vector.load %arg4[%c0_9, %c0_10] : memref<2x3xf32, #tpu.memory_space<vmem>>, vector<2x3xf32>
      %cst_11 = arith.constant 3.906250e-03 : f32
      %12 = vector.broadcast %cst_11 : f32 to vector<2x3xf32>
      %13 = arith.mulf %11, %12 : vector<2x3xf32>
      %14 = vector.extract_strided_slice %13 {offsets = [0, 0], sizes = [2, 1], strides = [1, 1]} : vector<2x3xf32> to vector<2x1xf32>
      %15 = vector.extract_strided_slice %13 {offsets = [0, 1], sizes = [2, 1], strides = [1, 1]} : vector<2x3xf32> to vector<2x1xf32>
      %16 = vector.extract_strided_slice %13 {offsets = [0, 2], sizes = [2, 1], strides = [1, 1]} : vector<2x3xf32> to vector<2x1xf32>
      %17 = arith.subf %14, %15 : vector<2x1xf32>
      %18 = arith.mulf %17, %17 : vector<2x1xf32>
      %19 = arith.subf %14, %16 : vector<2x1xf32>
      %20 = arith.mulf %19, %19 : vector<2x1xf32>
      %21 = arith.subf %16, %15 : vector<2x1xf32>
      %22 = arith.mulf %21, %21 : vector<2x1xf32>
      %23 = arith.mulf %18, %18 : vector<2x1xf32>
      %24 = arith.mulf %20, %20 : vector<2x1xf32>
      %25 = arith.addf %23, %24 : vector<2x1xf32>
      %26 = arith.mulf %22, %22 : vector<2x1xf32>
      %27 = arith.addf %25, %26 : vector<2x1xf32>
      %28 = math.sqrt %27 : vector<2x1xf32>
      %29 = vector.shape_cast %28 : vector<2x1xf32> to vector<2x1x1x1xf32>
      %c0_12 = arith.constant 0 : index
      %c0_13 = arith.constant 0 : index
      %c0_14 = arith.constant 0 : index
      %c0_15 = arith.constant 0 : index
      %30 = vector.load %arg3[%c0_12, %c0_13, %c0_14, %c0_15] : memref<2x1x1x1xf32, #tpu.memory_space<vmem>>, vector<2x1x1x1xf32>
      tpu.vector_store %arg3[%c0_12, %c0_13, %c0_14, %c0_15], %29 {strides = array<i32>} : memref<2x1x1x1xf32, #tpu.memory_space<vmem>>, vector<2x1x1x1xf32>,
    } else {
    }
    return
  }
  func.func @transform_0(%arg0: i32, %arg1: i32) -> (i32, i32, i32) {
    %c0_i32 = arith.constant 0 : i32
    %c0_i32_0 = arith.constant 0 : i32
    return %arg0, %c0_i32, %arg1 : i32, i32, i32
  }
  func.func @transform_1(%arg0: i32, %arg1: i32) -> (i32, i32, i32, i32) {
    %c0_i32 = arith.constant 0 : i32
    %c0_i32_0 = arith.constant 0 : i32
    %c0_i32_1 = arith.constant 0 : i32
    %c0_i32_2 = arith.constant 0 : i32
    return %arg0, %c0_i32, %c0_i32_0, %c0_i32_1 : i32, i32, i32, i32
  }
}

</mosaic_0001>

<bundles_post_ra>
// kernel: tpu_custom_call.1
= control target key start
LH: loop header
LB: loop body
LE: loop exit
PB: predicated region body
PF: predicated region fallthrough
CT: control target
= control target key end

     0   :  { %vm23_vm0 = vcmask 1042432   ;;  %vm12_vm1 = vcmask 17408   ;;  %v130_v10 = vmov 0.0   ;;  %v36_v11 = vlaneseq  ;;  %s132_s10 = smov 1   ;;  %s133_s11 = smov 127   ;;  %s157_s0 = inlined_call_operand.vmem [shape: f32[2,3,256], index: 0, kind: input, shape index: {}]   ;;  %s158_s1 = inlined_call_operand.vmem [shape: f32[2,1,1,1], index: 1, kind: output, shape index: {}]  }
   0x1   :  { %v14_v0 = vld [vmem:[%s157_s0] sm:$0x77]  ;;  %v15_v1 = vld [vmem:[%s157_s0 + $0x8] sm:$0x77]  ;;  %13 = vst.msk [vmem:[#allocation2] sm:$0x3] %vm12_vm1, %v130_v10 }
   0x2   :  { %v19_v2 = vcombine.high %v14_v0, %v14_v0  ;;  %v24_v3 = vsel %vm23_vm0, %v14_v0, 0.0  ;;  %v20_v4 = vcombine.high %v15_v1, %v15_v1  ;;  %v29_v6 = vsel %vm23_vm0, %v15_v1, 0.0  ;;  %s131_s0 = smov 126  }
   0x3   :  { %v37_v12 = vand.u32 127, %v36_v11  ;;  %v39_v13 = vshrl.u32 %v36_v11, 7  ;;  %vm46_vm2 = vcmask 1041409   ;;  %v134_v39 = vmov 1966171168  }
   0x4   :  { %v25_v5 = vsel %vm23_vm0, %v19_v2, 0.0  ;;  %v30_v7 = vsel %vm23_vm0, %v20_v4, 0.0  ;;  %v91_v40 = vunpack.c.l.s4 %v134_v39  ;;  %vm114_vm5 = vcmask 0  }
   0x5   :  { %v26_v8 = vadd.f32 %v25_v5, %v24_v3  ;;  %v31_v9 = vadd.f32 %v30_v7, %v29_v6  ;;  %v40_v15 = vsub.s32 %v37_v12, %v39_v13 }
   0x6   :  { %v92_v41 = vunpack.c.0.s8 %v91_v40 }
   0x7   :  { %27 = vadd.xlane.f32.xlu0 %v26_v8 }
   0x8   :  { %v16_v18 = vld [vmem:[#allocation2] sm:$0x3]  ;;  %v95_v43 = vsub.s32 %v92_v41, %v39_v13 }
   0xb   :  { %32 = vadd.xlane.f32.xlu0 %v31_v9 }
  0x90   :  { %v28_v14 = vpop.xlane.xlu0 %27 }
  0x91   :  { %v41_v17 = vrot.slane %v28_v14, %v40_v15 }
  0x94   :  { %v33_v16 = vpop.xlane.xlu0 %32 }
  0x95   :  { %v45_v19 = vrot.slane %v33_v16, %v40_v15 }
  0x97   :  { %v47_v20 = vsel %vm46_vm2, %v45_v19, %v41_v17 }
  0x98   :  { %v49_v21 = vadd.f32 %v47_v20, %v16_v18 }
  0x9a   :  { %51 = vst.msk [vmem:[#allocation2] sm:$0x3] %vm12_vm1, %v49_v21 }
  0xa1   :  { %v55_v22 = vld [vmem:[#allocation2] sm:$0x3] }
  0xa2   :  { %v56_v23 = vmul.f32 0.00390625, %v55_v22 }
  0xa4   :  { %63 = vrot.lane.b32.xlu0 %v56_v23, %s131_s0  ;;  %68 = vrot.lane.b32.xlu1 %v56_v23, %s132_s10 }
  0xa8   :  { %58 = vrot.lane.b32.xlu1 %v56_v23, %s133_s11 }
 0x116   :  { %v69_v24 = vpop.permute.xlu1 %68  ;;  %v64_v29 = vpop.permute.xlu0 %63 }
 0x117   :  { %v71_v25 = vsub.f32 %v56_v23, %v69_v24  ;;  %v66_v31 = vsub.f32 %v56_v23, %v64_v29 }
 0x119   :  { %v72_v26 = vmul.f32 %v71_v25, %v71_v25  ;;  %v67_v33 = vmul.f32 %v66_v31, %v66_v31 }
 0x11a   :  { %v59_v28 = vpop.permute.xlu1 %58 }
 0x11b   :  { %v76_v27 = vmul.f32 %v72_v26, %v72_v26  ;;  %v61_v30 = vsub.f32 %v56_v23, %v59_v28  ;;  %v74_v35 = vmul.f32 %v67_v33, %v67_v33 }
 0x11d   :  { %78 = vrot.lane.b32.xlu1 %v76_v27, %s131_s0  ;;  %v62_v32 = vmul.f32 %v61_v30, %v61_v30 }
 0x11f   :  { %v73_v34 = vmul.f32 %v62_v32, %v62_v32 }
 0x121   :  { %v75_v36 = vadd.f32 %v74_v35, %v73_v34 }
 0x18f   :  { %v79_v37 = vpop.permute.xlu1 %78 }
 0x190   :  { %v81_v38 = vadd.f32 %v79_v37, %v75_v36 }
 0x192   :  { %128 = vrsqrt.f32 %v81_v38  ;;  %vm84_vm3 = vcmp.eq.f32.partialorder %v81_v38, inf  ;;  %v87_v45 = vand.u32 2147483648, %v81_v38  ;;  %vm86_vm4 = vcmp.eq.f32.partialorder %v81_v38, 0.0 }
 0x19f   :  { %v129_v42 = vpop.eup %128 }
 0x1a0   :  { %v83_v44 = vmul.f32 %v129_v42, %v81_v38 }
 0x1a2   :  { %v85_v46 = vsel %vm84_vm3, %v81_v38, %v83_v44 }
 0x1a3   :  { %v88_v47 = vsel %vm86_vm4, %v87_v45, %v85_v46 }
 0x1a4   :  { %v96_v48 = vrot.slane %v88_v47, %v95_v43 }
 0x1a6   :  { %v97_v49 = vcombine.high %v96_v48, %v96_v48  ;;  %v104_v50 = vrot.slane %v96_v48, %v95_v43 }
 0x1a8   :  { %v111_v51 = vrot.slane %v97_v49, %v95_v43  ;;  %115 = vst.msk [vmem:[%s158_s1] sm:$0x1] %vm114_vm5, %v104_v50 }
 0x1aa   :  { %116 = vst.msk [vmem:[%s158_s1 + $0x1] sm:$0x1] %vm114_vm5, %v111_v51 }

</bundles_post_ra>
